<compile_context>
chip_gen: v7x
topology: tpu7x:2x2x1
jax: 0.10.0
libtpu: 0.0.40
codegen_flags: <defaults>
</compile_context>

<pallas_src>
import functools

import jax
import jax.numpy as jnp
import numpy as np
from jax.experimental import pallas as pl
from jax.experimental.pallas import tpu as pltpu

_LANE = 128        # vreg lane width (last-dim fast axis)
_SUBLANE = 8       # vreg sublane count (second-last-dim granularity, f32)
_F32_BYTES = 4


def _round_up(v, m):
    return (v + m - 1) // m * m


# ----------------------------- Pallas kernel -------------------------------

def _mlp_fused_kernel(x_ref, *refs):
    """Whole MLP forward for one M-tile. refs = (w1, b1, ..., wL, bL, out)."""
    out_ref = refs[-1]
    wb_refs = refs[:-1]
    n_layers = len(wb_refs) // 2

    h = x_ref[...]                                   # (bm, K0) f32, VMEM resident
    for i in range(n_layers):
        w = wb_refs[2 * i][...]                      # (K, N)   VMEM resident weights
        b = wb_refs[2 * i + 1][...]                  # (1, N)   broadcasts over rows
        h = jnp.dot(h, w, preferred_element_type=jnp.float32) + b
        if i < n_layers - 1:
            h = jnp.tanh(h)                          # EUP transcendental, f32
    # TODO(synk): if this ever becomes compute-bound at large bm, split the M-tile into
    # 2 sub-tiles here so layer i's tanh (EUP) overlaps layer i's matmul (MXU).
    out_ref[...] = h                                 # single lane-dense store


# ------------------------------- wrapper ------------------------------------

def prepare_params(torch_style_params):
    """One-time prep: (out,in) W -> (in,out) f32, b -> (1,out) f32.

    The LAST layer is zero-padded along its output dim to a multiple of 128 so the
    kernel's output store is lane-dense (no masked vst). Returns (prepared, n_out).
    """
    prepared = []
    n_layers = len(torch_style_params)
    for idx, (w, b) in enumerate(torch_style_params):
        wt = jnp.asarray(w, jnp.float32).T               # (in, out)
        bt = jnp.asarray(b, jnp.float32).reshape(1, -1)  # (1, out)
        if idx == n_layers - 1:
            n_out = wt.shape[1]
            n_pad = _round_up(n_out, _LANE)
            if n_pad != n_out:
                wt = jnp.pad(wt, ((0, 0), (0, n_pad - n_out)))
                bt = jnp.pad(bt, ((0, 0), (0, n_pad - n_out)))
        prepared.append((wt, bt))
    return prepared, int(torch_style_params[-1][0].shape[0])


@functools.partial(jax.jit, static_argnames=("n_out", "block_m"))
def simple_mlp_forward(x, prepared_params, n_out, block_m=512):
    """x: (..., in_features); prepared_params from prepare_params(); n_out static int."""
    x = jnp.asarray(x, jnp.float32)                  # mirrors torch.tensor(x, dtype=float)
    lead = x.shape[:-1]
    k0 = x.shape[-1]
    x2 = x.reshape(-1, k0)
    m = x2.shape[0]

    # Batch tiling. For batches of >=64 rows force at least 2 grid steps so the
    # "parallel" grid axis actually puts work on both TensorCores (v7x). Below that the
    # split is pure overhead, so keep a single tile.
    m_aligned = _round_up(max(m, 1), _SUBLANE)
    if m_aligned >= 64:
        bm = min(block_m, _round_up(pl.cdiv(m_aligned, 2), _SUBLANE))
    else:
        bm = min(block_m, m_aligned)
    mp = _round_up(m, bm)
    if mp != m:
        # Zero-padded rows flow through bias+tanh and are sliced off below -- harmless,
        # but do NOT reduce over the padded output.
        x2 = jnp.pad(x2, ((0, mp - m), (0, 0)))

    n_pad = prepared_params[-1][0].shape[1]          # lane-dense padded output width

    # Grid-invariant operands (index_map == (0,0) for every step): single-buffer them.
    const_kwargs = {"pipeline_mode": pl.Buffered(1)} if hasattr(pl, "Buffered") else {}

    flat_wb = []
    in_specs = [pl.BlockSpec((bm, k0), lambda i: (i, 0))]
    wb_bytes = 0
    for w, b in prepared_params:
        flat_wb += [w, b]
        in_specs += [pl.BlockSpec(w.shape, lambda i: (0, 0), **const_kwargs),
                     pl.BlockSpec(b.shape, lambda i: (0, 0), **const_kwargs)]
        wb_bytes += (w.size + b.size) * _F32_BYTES
    out_spec = pl.BlockSpec((bm, n_pad), lambda i: (i, 0))

    # Explicit VMEM budget (double-buffered in/out tiles + single-buffered weights +
    # per-layer activation values), with 2x headroom + 4 MiB. Keeps v7x (64 MiB physical,
    # 32 MiB scoped default) safe if block_m / net_arch are scaled up.
    widest = max(n_pad, _LANE, k0)
    act_bytes = bm * widest * _F32_BYTES * (len(prepared_params) + 1)
    vmem_limit = int(2 * (2 * bm * k0 * _F32_BYTES
                          + 2 * bm * n_pad * _F32_BYTES
                          + wb_bytes
                          + act_bytes)) + (4 << 20)

    out = pl.pallas_call(
        _mlp_fused_kernel,
        out_shape=jax.ShapeDtypeStruct((mp, n_pad), jnp.float32),
        grid=(mp // bm,),
        in_specs=in_specs,
        out_specs=out_spec,
        compiler_params=pltpu.CompilerParams(
            dimension_semantics=("parallel",),       # M-tiles shard across TCs on v7x
            vmem_limit_bytes=vmem_limit),
    )(x2, *flat_wb)

    return out[:m, :n_out].reshape(*lead, n_out)


# ------------------------ params + pure-JAX reference -----------------------

def init_params(key, net_arch):
    """PyTorch nn.Linear-style init: W (out,in), b (out,), U(-1/sqrt(in), 1/sqrt(in))."""
    params = []
    keys = jax.random.split(key, 2 * (len(net_arch) - 1))
    for idx, (fan_in, fan_out) in enumerate(zip(net_arch[:-1], net_arch[1:])):
        bound = 1.0 / np.sqrt(fan_in)
        w = jax.random.uniform(keys[2 * idx], (fan_out, fan_in), jnp.float32,
                               -bound, bound)
        b = jax.random.uniform(keys[2 * idx + 1], (fan_out,), jnp.float32,
                               -bound, bound)
        params.append((w, b))
    return params


def reference_forward(x, params):
    h = jnp.asarray(x, jnp.float32)
    for i, (w, b) in enumerate(params):
        h = jnp.dot(h, w.T, precision=jax.lax.Precision.HIGHEST) + b
        if i < len(params) - 1:
            h = jnp.tanh(h)
    return h


# ---------------------------------- main -------------------------------------

if __name__ == "__main__":
    net_arch = [32, 128, 128, 10]                    # in -> hidden -> hidden -> out
    key = jax.random.PRNGKey(0)
    pkey, xkey, xkey2 = jax.random.split(key, 3)

    params = init_params(pkey, net_arch)             # PyTorch-convention parameters
    prepared, n_out = prepare_params(params)         # one-time transpose / pad / reshape

    # Small-shape check: (batch, seq, features) -> single M-tile path.
    x = jax.random.normal(xkey, (2, 8, 32), jnp.float32)
    out = jax.block_until_ready(simple_mlp_forward(x, prepared, n_out))
    assert out.shape == (2, 8, net_arch[-1]), out.shape
    ref = reference_forward(x, params)
    np.testing.assert_allclose(np.asarray(out), np.asarray(ref), atol=1e-2, rtol=1e-2)

    # Larger batch check: exercises the >=2-grid-step split and row padding path.
    x_big = jax.random.normal(xkey2, (200, 32), jnp.float32)
    out_big = jax.block_until_ready(simple_mlp_forward(x_big, prepared, n_out))
    assert out_big.shape == (200, net_arch[-1]), out_big.shape
    ref_big = reference_forward(x_big, params)
    np.testing.assert_allclose(np.asarray(out_big), np.asarray(ref_big),
                               atol=1e-2, rtol=1e-2)

    print("KERNEL_OK")
</pallas_src>

<mosaic_0001>
module attributes {stable_mosaic.version = 11 : i64} {
  func.func @_mlp_fused_kernel(%arg0: i32, %arg1: memref<16x32xf32, #tpu.memory_space<vmem>>, %arg2: memref<32x128xf32, #tpu.memory_space<vmem>>, %arg3: memref<1x128xf32, #tpu.memory_space<vmem>>, %arg4: memref<128x128xf32, #tpu.memory_space<vmem>>, %arg5: memref<1x128xf32, #tpu.memory_space<vmem>>, %arg6: memref<128x128xf32, #tpu.memory_space<vmem>>, %arg7: memref<1x128xf32, #tpu.memory_space<vmem>>, %arg8: memref<16x128xf32, #tpu.memory_space<vmem>>) attributes {dimension_semantics = [#tpu.dimension_semantics<parallel>], iteration_bounds = array<i64: 1>, scalar_prefetch = 0 : i64, scratch_operands = 0 : i64, tpu.core_type = #tpu.core_type<tc>, window_params = [{transform_indices = @transform_0, window_bounds = array<i64: 16, 32>}, {pipeline_mode = #tpu.pipeline_mode<synchronous>, transform_indices = @transform_1, window_bounds = array<i64: 32, 128>}, {pipeline_mode = #tpu.pipeline_mode<synchronous>, transform_indices = @transform_2, window_bounds = array<i64: 1, 128>}, {pipeline_mode = #tpu.pipeline_mode<synchronous>, transform_indices = @transform_3, window_bounds = array<i64: 128, 128>}, {pipeline_mode = #tpu.pipeline_mode<synchronous>, transform_indices = @transform_4, window_bounds = array<i64: 1, 128>}, {pipeline_mode = #tpu.pipeline_mode<synchronous>, transform_indices = @transform_5, window_bounds = array<i64: 128, 128>}, {pipeline_mode = #tpu.pipeline_mode<synchronous>, transform_indices = @transform_6, window_bounds = array<i64: 1, 128>}, {transform_indices = @transform_7, window_bounds = array<i64: 16, 128>}]} {
    %c0 = arith.constant 0 : index
    %c0_0 = arith.constant 0 : index
    %0 = vector.load %arg1[%c0, %c0_0] : memref<16x32xf32, #tpu.memory_space<vmem>>, vector<16x32xf32>
    %c0_1 = arith.constant 0 : index
    %c0_2 = arith.constant 0 : index
    %1 = vector.load %arg2[%c0_1, %c0_2] : memref<32x128xf32, #tpu.memory_space<vmem>>, vector<32x128xf32>
    %c0_3 = arith.constant 0 : index
    %c0_4 = arith.constant 0 : index
    %2 = vector.load %arg3[%c0_3, %c0_4] : memref<1x128xf32, #tpu.memory_space<vmem>>, vector<1x128xf32>
    %cst = arith.constant dense<0.000000e+00> : vector<16x128xf32>
    %3 = tpu.matmul %0, %1, %cst {dimension_numbers = #tpu.dot_dimension_numbers<[1], [0], [0], [1], [0, 0, 1, 1], [], []>} : vector<16x32xf32>, vector<32x128xf32>, vector<16x128xf32> -> vector<16x128xf32>
    %4 = vector.broadcast %2 : vector<1x128xf32> to vector<16x128xf32>
    %5 = arith.addf %3, %4 : vector<16x128xf32>
    %6 = math.tanh %5 : vector<16x128xf32>
    %c0_5 = arith.constant 0 : index
    %c0_6 = arith.constant 0 : index
    %7 = vector.load %arg4[%c0_5, %c0_6] : memref<128x128xf32, #tpu.memory_space<vmem>>, vector<128x128xf32>
    %c0_7 = arith.constant 0 : index
    %c0_8 = arith.constant 0 : index
    %8 = vector.load %arg5[%c0_7, %c0_8] : memref<1x128xf32, #tpu.memory_space<vmem>>, vector<1x128xf32>
    %cst_9 = arith.constant dense<0.000000e+00> : vector<16x128xf32>
    %9 = tpu.matmul %6, %7, %cst_9 {dimension_numbers = #tpu.dot_dimension_numbers<[1], [0], [0], [1], [0, 0, 1, 1], [], []>} : vector<16x128xf32>, vector<128x128xf32>, vector<16x128xf32> -> vector<16x128xf32>
    %10 = vector.broadcast %8 : vector<1x128xf32> to vector<16x128xf32>
    %11 = arith.addf %9, %10 : vector<16x128xf32>
    %12 = math.tanh %11 : vector<16x128xf32>
    %c0_10 = arith.constant 0 : index
    %c0_11 = arith.constant 0 : index
    %13 = vector.load %arg6[%c0_10, %c0_11] : memref<128x128xf32, #tpu.memory_space<vmem>>, vector<128x128xf32>
    %c0_12 = arith.constant 0 : index
    %c0_13 = arith.constant 0 : index
    %14 = vector.load %arg7[%c0_12, %c0_13] : memref<1x128xf32, #tpu.memory_space<vmem>>, vector<1x128xf32>
    %cst_14 = arith.constant dense<0.000000e+00> : vector<16x128xf32>
    %15 = tpu.matmul %12, %13, %cst_14 {dimension_numbers = #tpu.dot_dimension_numbers<[1], [0], [0], [1], [0, 0, 1, 1], [], []>} : vector<16x128xf32>, vector<128x128xf32>, vector<16x128xf32> -> vector<16x128xf32>
    %16 = vector.broadcast %14 : vector<1x128xf32> to vector<16x128xf32>
    %17 = arith.addf %15, %16 : vector<16x128xf32>
    %c0_15 = arith.constant 0 : index
    %c0_16 = arith.constant 0 : index
    %18 = vector.load %arg8[%c0_15, %c0_16] : memref<16x128xf32, #tpu.memory_space<vmem>>, vector<16x128xf32>
    tpu.vector_store %arg8[%c0_15, %c0_16], %17 {strides = array<i32>} : memref<16x128xf32, #tpu.memory_space<vmem>>, vector<16x128xf32>,
    return
  }
  func.func @transform_0(%arg0: i32) -> (i32, i32) {
    %c0_i32 = arith.constant 0 : i32
    %c0_i32_0 = arith.constant 0 : i32
    return %arg0, %c0_i32 : i32, i32
  }
  func.func @transform_1(%arg0: i32) -> (i32, i32) {
    %c0_i32 = arith.constant 0 : i32
    %c0_i32_0 = arith.constant 0 : i32
    %c0_i32_1 = arith.constant 0 : i32
    return %c0_i32, %c0_i32_0 : i32, i32
  }
  func.func @transform_2(%arg0: i32) -> (i32, i32) {
    %c0_i32 = arith.constant 0 : i32
    %c0_i32_0 = arith.constant 0 : i32
    %c0_i32_1 = arith.constant 0 : i32
    return %c0_i32, %c0_i32_0 : i32, i32
  }
  func.func @transform_3(%arg0: i32) -> (i32, i32) {
    %c0_i32 = arith.constant 0 : i32
    %c0_i32_0 = arith.constant 0 : i32
    %c0_i32_1 = arith.constant 0 : i32
    return %c0_i32, %c0_i32_0 : i32, i32
  }
  func.func @transform_4(%arg0: i32) -> (i32, i32) {
    %c0_i32 = arith.constant 0 : i32
    %c0_i32_0 = arith.constant 0 : i32
    %c0_i32_1 = arith.constant 0 : i32
    return %c0_i32, %c0_i32_0 : i32, i32
  }
  func.func @transform_5(%arg0: i32) -> (i32, i32) {
    %c0_i32 = arith.constant 0 : i32
    %c0_i32_0 = arith.constant 0 : i32
    %c0_i32_1 = arith.constant 0 : i32
    return %c0_i32, %c0_i32_0 : i32, i32
  }
  func.func @transform_6(%arg0: i32) -> (i32, i32) {
    %c0_i32 = arith.constant 0 : i32
    %c0_i32_0 = arith.constant 0 : i32
    %c0_i32_1 = arith.constant 0 : i32
    return %c0_i32, %c0_i32_0 : i32, i32
  }
  func.func @transform_7(%arg0: i32) -> (i32, i32) {
    %c0_i32 = arith.constant 0 : i32
    %c0_i32_0 = arith.constant 0 : i32
    return %arg0, %c0_i32 : i32, i32
  }
}

</mosaic_0001>

<bundles_post_ra>
// kernel: simple_mlp_forward.1
= control target key start
LH: loop header
LB: loop body
LE: loop exit
PB: predicated region body
PF: predicated region fallthrough
CT: control target
= control target key end

     0   :  { %12 = vsyncpa [#allocation3], 0  ;;  %s830_s0 = inlined_call_operand.hbm [shape: f32[16,32], index: 0, kind: input, shape index: {}]   ;;  %s831_s1 = inlined_call_operand.hbm [shape: f32[32,128], index: 1, kind: input, shape index: {}]   ;;  %s832_s2 = inlined_call_operand.vmem [shape: f32[1,128], index: 2, kind: input, shape index: {}]   ;;  %s833_s3 = inlined_call_operand.hbm [shape: f32[128,128], index: 3, kind: input, shape index: {}]   ;;  %s834_s4 = inlined_call_operand.vmem [shape: f32[1,128], index: 4, kind: input, shape index: {}]   ;;  %s835_s5 = inlined_call_operand.hbm [shape: f32[128,128], index: 5, kind: input, shape index: {}]   ;;  %s836_s6 = inlined_call_operand.vmem [shape: f32[1,128], index: 6, kind: input, shape index: {}]   ;;  %s837_s7 = inlined_call_operand.vmem [shape: f32[16,128], index: 7, kind: output, shape index: {}]  }
   0x1   :  { %13 = vsyncpa [#allocation5], 0 }
   0x2   :  { %14 = vsyncpa [#allocation8], 0  ;;  %s693_s24 = smov [#allocation4]   ;;  %s694_s26 = smov [#allocation2]  }
   0x3   :  { %s32_s25 = sshll.u32 %s693_s24, 4  ;;  %s20_s27 = sshll.u32 %s694_s26, 4  ;;  %s33_s25 = int_to_ptr.vmem [resolvable:$true] %s32_s25  ;;  %s739_s27 = int_to_ptr.vmem [resolvable:$true] %s20_s27 }
   0x4   :  { %s599_s30 = scalar_lea.hbm %s831_s1, 512 }
   0x5   :  { %p600_p0 = scmp.ne.s32.totalorder %s831_s1, %s599_s30  ;;  %p603_p1 = scmp.lt.u32.totalorder %s599_s30, %s831_s1 }
   0x7   :  { %p605_p2 = pnand %p603_p1, %p600_p0 }
   0x9   :  { %608 = shalt.err (!%p605_p2)
}
   0xa   :  { %s609_s12 = scalar_lea.vmem %s33_s25, 512  ;;  %p614_p4 = scmp.lt.s32.totalorder %s33_s25, %s33_s25 }
   0xb   :  { %p610_p3 = scmp.ne.s32.totalorder %s33_s25, %s609_s12  ;;  %p615_p5 = scmp.lt.s32.totalorder %s609_s12, %s609_s12 }
   0xd   :  { %p616_p6 = por %p615_p5, %p614_p4 }
   0xf   :  { %p617_p7 = pnand %p616_p6, %p610_p3 }
  0x11   :  { %620 = shalt.err (!%p617_p7)
}
  0x12   :  { %s695_s13 = smov 128   ;;  %s696_s14 = smov 8  }
  0x13   :  { %38 = dma.hbm_to_vmem [thread:$0]  %s831_s1, 512, %s33_s25, [#allocation5], %s695_s13, %s695_s13, %s696_s14  }
  0x14   :  { %s621_s19 = scalar_lea.hbm %s830_s0, 256 }
  0x15   :  { %p622_p8 = scmp.ne.s32.totalorder %s830_s0, %s621_s19  ;;  %p625_p9 = scmp.lt.u32.totalorder %s621_s19, %s830_s0 }
  0x17   :  { %p627_p10 = pnand %p625_p9, %p622_p8 }
  0x19   :  { %630 = shalt.err (!%p627_p10)
}
  0x1a   :  { %s631_s24 = scalar_lea.vmem %s739_s27, 256  ;;  %p636_p12 = scmp.lt.s32.totalorder %s739_s27, %s739_s27 }
  0x1b   :  { %p632_p11 = scmp.ne.s32.totalorder %s739_s27, %s631_s24  ;;  %p637_p13 = scmp.lt.s32.totalorder %s631_s24, %s631_s24 }
  0x1d   :  { %p638_p0 = por %p637_p13, %p636_p12 }
  0x1f   :  { %p639_p1 = pnand %p638_p0, %p632_p11 }
  0x21   :  { %642 = shalt.err (!%p639_p1)
}
  0x22   :  { %26 = dma.hbm_to_vmem [thread:$0]  %s830_s0, 256, %s739_s27, [#allocation3], %s695_s13, %s695_s13, %s696_s14  }
  0x23   :  { %s697_s26 = smov [#allocation6]   ;;  %s698_s29 = smov [#allocation7]  }
  0x24   :  { %s46_s28 = sshll.u32 %s697_s26, 4  ;;  %s60_s30 = sshll.u32 %s698_s29, 4  ;;  %s47_s28 = int_to_ptr.vmem [resolvable:$true] %s46_s28  ;;  %s776_s30 = int_to_ptr.vmem [resolvable:$true] %s60_s30 }
  0x25   :  { %s643_s10 = scalar_lea.hbm %s833_s3, 2048 }
  0x26   :  { %p644_p2 = scmp.ne.s32.totalorder %s833_s3, %s643_s10  ;;  %p647_p3 = scmp.lt.u32.totalorder %s643_s10, %s833_s3 }
  0x28   :  { %p649_p4 = pnand %p647_p3, %p644_p2 }
  0x2a   :  { %652 = shalt.err (!%p649_p4)
}
  0x2b   :  { %s653_s0 = scalar_lea.vmem %s47_s28, 2048  ;;  %p658_p6 = scmp.lt.s32.totalorder %s47_s28, %s47_s28 }
  0x2c   :  { %p654_p5 = scmp.ne.s32.totalorder %s47_s28, %s653_s0  ;;  %p659_p7 = scmp.lt.s32.totalorder %s653_s0, %s653_s0 }
  0x2e   :  { %p660_p8 = por %p659_p7, %p658_p6 }
  0x30   :  { %p661_p9 = pnand %p660_p8, %p654_p5 }
  0x32   :  { %664 = shalt.err (!%p661_p9)
}
  0x33   :  { %52 = dma.hbm_to_vmem [thread:$0]  %s833_s3, 2048, %s47_s28, [#allocation5], %s695_s13, %s695_s13, %s696_s14  }
  0x34   :  { %s665_s20 = scalar_lea.hbm %s835_s5, 2048 }
  0x35   :  { %p666_p10 = scmp.ne.s32.totalorder %s835_s5, %s665_s20  ;;  %p669_p11 = scmp.lt.u32.totalorder %s665_s20, %s835_s5 }
  0x37   :  { %p671_p12 = pnand %p669_p11, %p666_p10 }
  0x39   :  { %674 = shalt.err (!%p671_p12)
}
  0x3a   :  { %s675_s1 = scalar_lea.vmem %s776_s30, 2048  ;;  %p680_p0 = scmp.lt.s32.totalorder %s776_s30, %s776_s30 }
  0x3b   :  { %p676_p13 = scmp.ne.s32.totalorder %s776_s30, %s675_s1  ;;  %p681_p1 = scmp.lt.s32.totalorder %s675_s1, %s675_s1 }
  0x3d   :  { %p682_p2 = por %p681_p1, %p680_p0 }
  0x3f   :  { %p683_p3 = pnand %p682_p2, %p676_p13 }
  0x41   :  { %686 = shalt.err (!%p683_p3)
}
  0x42   :  { %66 = dma.hbm_to_vmem [thread:$0]  %s835_s5, 2048, %s776_s30, [#allocation8], %s695_s13, %s695_s13, %s696_s14  }
  0x43   :  { %687 = dma.done.wait [#allocation3], 256  }
  0x44   :  { %688 = vsyncadd [#allocation3], 4294967040 }
  0x45   :  { %689 = dma.done.wait [#allocation5], 2560  }
  0x46   :  { %690 = vsyncadd [#allocation5], 4294964736 }
  0x47   :  { %691 = dma.done.wait [#allocation8], 2048  }
  0x48   :  { %692 = vsyncadd [#allocation8], 4294965248  ;;  %vm94_vm0 = vcmask 261120   ;;  %v83_v0 = vld [vmem:[#allocation4] sm:$0xff]  ;;  %v84_v1 = vld [vmem:[#allocation4 + $0x8] sm:$0xff] }
  0x49   :  { %v85_v2 = vld [vmem:[#allocation4 + $0x10] sm:$0xff]  ;;  %v513_v3 = vpack.c.bf16 %v84_v1, %v83_v0  ;;  %v86_v4 = vld [vmem:[#allocation4 + $0x18] sm:$0xff]  ;;  %v178_v7 = vld [vmem:[#allocation6] sm:$0xff] }
  0x4a   :  { %v81_v5 = vld [vmem:[#allocation2] sm:$0xff]  ;;  %v517_v6 = vpack.c.bf16 %v86_v4, %v85_v2  ;;  %v179_v8 = vld [vmem:[#allocation6 + $0x8] sm:$0xff]  ;;  %v181_v11 = vld [vmem:[#allocation6 + $0x18] sm:$0xff] }
  0x4b   :  { %440 = vmatprep.mubr.msk.f32.mxu0 %vm94_vm0, %v81_v5  ;;  %v180_v9 = vld [vmem:[#allocation6 + $0x10] sm:$0xff]  ;;  %514 = vmatprep.subr.bf16.mxu0 %v513_v3  ;;  %v521_v10 = vpack.c.bf16 %v179_v8, %v178_v7  ;;  %v182_v13 = vld [vmem:[#allocation6 + $0x20] sm:$0xff]  ;;  %v183_v14 = vld [vmem:[#allocation6 + $0x28] sm:$0xff] }
  0x4c   :  { %516 = vmatpush3.bf16.msra.mxu0 %v513_v3  ;;  %v525_v12 = vpack.c.bf16 %v181_v11, %v180_v9  ;;  %v529_v15 = vpack.c.bf16 %v183_v14, %v182_v13  ;;  %v82_v16 = vld [vmem:[#allocation2 + $0x8] sm:$0xff]  ;;  %v184_v17 = vld [vmem:[#allocation6 + $0x30] sm:$0xff]  ;;  %v186_v20 = vld [vmem:[#allocation6 + $0x40] sm:$0xff] }
  0x4d   :  { %518 = vmatprep.subr.bf16.mxu0 %v517_v6  ;;  %522 = vmatprep.subr.bf16.mxu1 %v521_v10  ;;  %v185_v18 = vld [vmem:[#allocation6 + $0x38] sm:$0xff]  ;;  %v187_v21 = vld [vmem:[#allocation6 + $0x48] sm:$0xff]  ;;  %v188_v23 = vld [vmem:[#allocation6 + $0x50] sm:$0xff] }
  0x4e   :  { %524 = vmatpush3.bf16.msra.mxu1 %v521_v10  ;;  %v533_v19 = vpack.c.bf16 %v185_v18, %v184_v17  ;;  %v537_v22 = vpack.c.bf16 %v187_v21, %v186_v20  ;;  %v189_v24 = vld [vmem:[#allocation6 + $0x58] sm:$0xff]  ;;  %v190_v26 = vld [vmem:[#allocation6 + $0x60] sm:$0xff]  ;;  %v191_v27 = vld [vmem:[#allocation6 + $0x68] sm:$0xff] }
  0x4f   :  { %526 = vmatprep.subr.bf16.mxu1 %v525_v12  ;;  %v541_v25 = vpack.c.bf16 %v189_v24, %v188_v23  ;;  %v192_v28 = vld [vmem:[#allocation6 + $0x70] sm:$0xff]  ;;  %v545_v29 = vpack.c.bf16 %v191_v27, %v190_v26  ;;  %v193_v30 = vld [vmem:[#allocation6 + $0x78] sm:$0xff]  ;;  %v278_v32 = vld [vmem:[#allocation7] sm:$0xff] }
  0x50   :  { %520 = vmatpush3.bf16.msra.mxu0 %v517_v6  ;;  %v549_v31 = vpack.c.bf16 %v193_v30, %v192_v28  ;;  %v279_v33 = vld [vmem:[#allocation7 + $0x8] sm:$0xff]  ;;  %v280_v34 = vld [vmem:[#allocation7 + $0x10] sm:$0xff]  ;;  %v281_v36 = vld [vmem:[#allocation7 + $0x18] sm:$0xff] }
  0x51   :  { %v553_v35 = vpack.c.bf16 %v279_v33, %v278_v32  ;;  %v557_v37 = vpack.c.bf16 %v281_v36, %v280_v34  ;;  %v282_v38 = vld [vmem:[#allocation7 + $0x20] sm:$0xff]  ;;  %v283_v39 = vld [vmem:[#allocation7 + $0x28] sm:$0xff]  ;;  %v284_v41 = vld [vmem:[#allocation7 + $0x30] sm:$0xff] }
  0x52   :  { %528 = vmatpush3.bf16.msra.mxu1 %v525_v12  ;;  %v561_v40 = vpack.c.bf16 %v283_v39, %v282_v38  ;;  %v285_v42 = vld [vmem:[#allocation7 + $0x38] sm:$0xff]  ;;  %v385_v44 = vld [vmem:[%s832_s2] ss:$0 sm:$0xff]  ;;  %v286_v51 = vld [vmem:[#allocation7 + $0x40] sm:$0xff] }
  0x53   :  { %441 = vmatmul.mubr.msk.f32.vlgmr.msra.gmra.mrb[0].mxu0 %vm94_vm0, %v82_v16  ;;  %530 = vmatprep.subr.bf16.mxu1 %v529_v15  ;;  %v565_v43 = vpack.c.bf16 %v285_v42, %v284_v41  ;;  %v287_v52 = vld [vmem:[#allocation7 + $0x48] sm:$0xff]  ;;  %v288_v54 = vld [vmem:[#allocation7 + $0x50] sm:$0xff]  ;;  %v289_v55 = vld [vmem:[#allocation7 + $0x58] sm:$0xff] }
  0x54   :  { %554 = vmatprep.subr.bf16.mxu0 %v553_v35  ;;  %v569_v53 = vpack.c.bf16 %v287_v52, %v286_v51  ;;  %v573_v56 = vpack.c.bf16 %v289_v55, %v288_v54  ;;  %v290_v57 = vld [vmem:[#allocation7 + $0x60] sm:$0xff]  ;;  %v291_v58 = vld [vmem:[#allocation7 + $0x68] sm:$0xff]  ;;  %v292_v59 = vld [vmem:[#allocation7 + $0x70] sm:$0xff] }
  0x55   :  { %556 = vmatpush3.bf16.msra.mxu0 %v553_v35  ;;  %v577_v60 = vpack.c.bf16 %v291_v58, %v290_v57  ;;  %v293_v61 = vld [vmem:[#allocation7 + $0x78] sm:$0xff]  ;;  %v388_v63 = vld [vmem:[%s834_s4] ss:$0 sm:$0xff] }
  0x56   :  { %532 = vmatpush3.bf16.msra.mxu1 %v529_v15  ;;  %558 = vmatprep.subr.bf16.mxu0 %v557_v37  ;;  %v581_v62 = vpack.c.bf16 %v293_v61, %v292_v59  ;;  %v389_v6 = vld [vmem:[%s836_s6] ss:$0 sm:$0xff] }
  0x57   :  { %534 = vmatprep.subr.bf16.mxu1 %v533_v19 }
  0x59   :  { %560 = vmatpush3.bf16.msra.mxu0 %v557_v37 }
  0x5a   :  { %536 = vmatpush3.bf16.msra.mxu1 %v533_v19  ;;  %562 = vmatprep.subr.bf16.mxu0 %v561_v40 }
  0x5b   :  { %538 = vmatprep.subr.bf16.mxu1 %v537_v22 }
  0x5d   :  { %564 = vmatpush3.bf16.msra.mxu0 %v561_v40 }
  0x5e   :  { %540 = vmatpush3.bf16.msra.mxu1 %v537_v22  ;;  %566 = vmatprep.subr.bf16.mxu0 %v565_v43 }
  0x5f   :  { %542 = vmatprep.subr.bf16.mxu1 %v541_v25 }
  0x61   :  { %568 = vmatpush3.bf16.msra.mxu0 %v565_v43 }
  0x62   :  { %544 = vmatpush3.bf16.msra.mxu1 %v541_v25  ;;  %570 = vmatprep.subr.bf16.mxu0 %v569_v53 }
  0x63   :  { %546 = vmatprep.subr.bf16.mxu1 %v545_v29 }
  0x65   :  { %572 = vmatpush3.bf16.msra.mxu0 %v569_v53 }
  0x66   :  { %548 = vmatpush3.bf16.msra.mxu1 %v545_v29  ;;  %574 = vmatprep.subr.bf16.mxu0 %v573_v56 }
  0x67   :  { %550 = vmatprep.subr.bf16.mxu1 %v549_v31 }
  0x69   :  { %576 = vmatpush3.bf16.msra.mxu0 %v573_v56 }
  0x6a   :  { %552 = vmatpush3.bf16.msra.mxu1 %v549_v31  ;;  %578 = vmatprep.subr.bf16.mxu0 %v577_v60 }
  0x6d   :  { %580 = vmatpush3.bf16.msra.mxu0 %v577_v60 }
  0x6e   :  { %582 = vmatprep.subr.bf16.mxu0 %v581_v62 }
  0x71   :  { %584 = vmatpush3.bf16.msra.mxu0 %v581_v62 }
 0x126   :  { %v442_v45 = vpop.f32.mrb[0].mxu0 }
 0x127   :  { %v173_v46 = vadd.f32 %v442_v45, %v385_v44  ;;  %v167_v47 = vpop.f32.mrb[1].mxu0 }
 0x128   :  { %v168_v48 = vadd.f32 %v385_v44, %v167_v47 }
 0x12a   :  { %591 = vtanh.f32 %v168_v48 }
 0x12b   :  { %593 = vtanh.f32 %v173_v46 }
 0x134   :  { %v592_v49 = vpop.eup %591 }
 0x135   :  { %v594_v50 = vpop.eup %593  ;;  %475 = vmatprep.mubr.f32.mxu1 %v592_v49 }
 0x136   :  { %476 = vmatmul.mubr.f32.vlgmr.msra.gmra.mrb[0].mxu1 %v594_v50 }
 0x209   :  { %v477_v0 = vpop.f32.mrb[0].mxu1 }
 0x20a   :  { %v273_v1 = vadd.f32 %v477_v0, %v388_v63  ;;  %v267_v2 = vpop.f32.mrb[1].mxu1 }
 0x20b   :  { %v268_v3 = vadd.f32 %v388_v63, %v267_v2 }
 0x20d   :  { %595 = vtanh.f32 %v268_v3 }
 0x20e   :  { %597 = vtanh.f32 %v273_v1 }
 0x217   :  { %v596_v4 = vpop.eup %595 }
 0x218   :  { %v598_v5 = vpop.eup %597  ;;  %510 = vmatprep.mubr.f32.mxu0 %v596_v4 }
 0x219   :  { %511 = vmatmul.mubr.f32.vlgmr.msra.gmra.mrb[2].mxu0 %v598_v5 }
 0x2ec   :  { %v512_v7 = vpop.f32.mrb[2].mxu0 }
 0x2ed   :  { %v373_v8 = vadd.f32 %v512_v7, %v389_v6  ;;  %v367_v9 = vpop.f32.mrb[3].mxu0 }
 0x2ee   :  { %v368_v10 = vadd.f32 %v389_v6, %v367_v9 }
 0x2ef   :  { %377 = vst [vmem:[%s837_s7 + $0x8] sm:$0xff] %v373_v8 }
 0x2f0   :  { %376 = vst [vmem:[%s837_s7] sm:$0xff] %v368_v10 }
 0x2f1   :  { %382 = vsyncpa [#allocation3], 1 }
 0x2f2   :  { %383 = vsyncpa [#allocation5], 1 }
 0x2f3   :  { %384 = vsyncpa [#allocation8], 1 }

</bundles_post_ra>
